<compile_context>
chip_gen: v5e
topology: v5e:2x2
jax: 0.10.0
libtpu: 0.0.40
codegen_flags: <defaults>
</compile_context>

<pallas_src>
import functools

import jax
import jax.numpy as jnp
from jax.experimental import pallas as pl
from jax.experimental.pallas import tpu as pltpu


_LANE = 128          # lane-dense last dim (multiple of 128 -> full-width vector loads)
_TILE_ROWS = 512     # 512*128*4B = 256 KiB / input tile; x3 inputs x2 buffers ~ 1.5 MiB VMEM


def _sums_kernel(rows, tile_rows, tgt_ref, pred_ref, post_ref, mu_ref, ls_ref,
                 out_ref):
    """Accumulates over the 1-D row-tile grid:

    out_ref (SMEM, f32[3]):
      [0] sum |mel_predictions     - mel_targets|
      [1] sum |postnet_predictions - mel_targets|
      [2] sum (exp(log_sigma) + mu^2 - 1 - log_sigma)   (computed once, at i == 0)
    """
    i = pl.program_id(0)

    @pl.when(i == 0)
    def _init():
        mu = mu_ref[...].astype(jnp.float32)
        ls = ls_ref[...].astype(jnp.float32)
        out_ref[0] = jnp.float32(0.0)
        out_ref[1] = jnp.float32(0.0)
        out_ref[2] = jnp.sum(jnp.exp(ls) + mu * mu - 1.0 - ls)

    tgt = tgt_ref[...].astype(jnp.float32)
    d1 = jnp.abs(pred_ref[...].astype(jnp.float32) - tgt)
    d2 = jnp.abs(post_ref[...].astype(jnp.float32) - tgt)

    tile_is_full = (i + 1) * tile_rows <= rows

    @pl.when(tile_is_full)
    def _full_tile():
        out_ref[0] += jnp.sum(d1)
        out_ref[1] += jnp.sum(d2)

    @pl.when(jnp.logical_not(tile_is_full))
    def _ragged_tail():
        lane = tgt_ref.shape[1]
        row_idx = jax.lax.broadcasted_iota(jnp.int32, (tile_rows, lane), 0)
        valid = (i * tile_rows + row_idx) < rows
        out_ref[0] += jnp.sum(jnp.where(valid, d1, 0.0))
        out_ref[1] += jnp.sum(jnp.where(valid, d2, 0.0))


def _flatten_lane_dense(x, pad_elems):
    flat = x.reshape(-1)
    if pad_elems:
        flat = jnp.pad(flat, (0, pad_elems))   # zero pad: exact no-op for |a-b| sums
    return flat.reshape(-1, _LANE)


def _loss_sums(mel_targets, mel_predictions, postnet_mel_predictions, mu,
               log_sigma, *, tile_rows=_TILE_ROWS):
    total = mel_targets.size
    pad_elems = (-total) % _LANE

    tgt = _flatten_lane_dense(mel_targets, pad_elems)
    pred = _flatten_lane_dense(mel_predictions, pad_elems)
    post = _flatten_lane_dense(postnet_mel_predictions, pad_elems)
    rows = tgt.shape[0]

    # Single full-array block if everything fits in one tile; otherwise fixed
    # (tile_rows, 128) tiles (tile_rows must be a multiple of 8 in that case).
    tile_rows = rows if rows <= tile_rows else tile_rows
    grid = pl.cdiv(rows, tile_rows)

    itemsize = mel_targets.dtype.itemsize
    cost = pl.CostEstimate(
        flops=6 * total + 4 * mu.size,
        transcendentals=mu.size,
        bytes_accessed=3 * total * itemsize
                       + (mu.size + log_sigma.size) * mu.dtype.itemsize + 12,
    )

    kernel = functools.partial(_sums_kernel, rows, tile_rows)
    mel_spec = pl.BlockSpec((tile_rows, _LANE), lambda i: (i, 0))

    return pl.pallas_call(
        kernel,
        out_shape=jax.ShapeDtypeStruct((3,), jnp.float32),
        grid_spec=pltpu.PrefetchScalarGridSpec(
            num_scalar_prefetch=0,
            grid=(grid,),
            in_specs=[
                mel_spec, mel_spec, mel_spec,
                pl.BlockSpec(mu.shape, lambda i: (0, 0)),          # resident (DMA'd once)
                pl.BlockSpec(log_sigma.shape, lambda i: (0, 0)),   # resident (DMA'd once)
            ],
            out_specs=pl.BlockSpec((3,), lambda i: (0,),
                                   memory_space=pltpu.MemorySpace.SMEM),
        ),
        compiler_params=pltpu.CompilerParams(
            dimension_semantics=("arbitrary",)),
        cost_estimate=cost,
    )(tgt, pred, post, mu, log_sigma)


class DisentangleLoss:
    """JAX/Pallas port of the PyTorch DisentangleLoss forward pass."""

    def __init__(self, preprocess_config, model_config, train_config):
        self.train_config = train_config

    def forward(self, inputs, predictions, step):
        mel_targets, mel_lens, max_mel_len, speaker_embeddings = inputs
        (mel_predictions, postnet_mel_predictions, _unused,
         content_vq_loss, mu, log_sigma) = predictions

        sums = _loss_sums(mel_targets, mel_predictions,
                          postnet_mel_predictions, mu, log_sigma)
        abs_sum_pred, abs_sum_post, kl_sum = sums[0], sums[1], sums[2]

        # mask.expand_as(mel_targets).sum() == sum(mel_lens) * n_mels  (scalar path)
        n_mels = mel_targets.shape[-1]
        mask_sum = jnp.sum(mel_lens).astype(jnp.float32) * jnp.float32(n_mels)

        n_mel_elems = jnp.float32(mel_targets.size)
        n_latent_elems = jnp.float32(mu.size)

        # nn.L1Loss() default reduction='mean' -> scalar; then * mask_sum / mask_sum
        # (kept literally, matching the PyTorch module's semantics).
        mae_pred = abs_sum_pred / n_mel_elems
        mae_post = abs_sum_post / n_mel_elems
        mel_loss = (mae_pred * mask_sum) / mask_sum
        postnet_mel_loss = (mae_post * mask_sum) / mask_sum

        style_kl_loss = 0.5 * (kl_sum / n_latent_elems)

        lam = self.train_config['lambda']
        if step >= lam['annealing_iters']:
            lambda_kl = lam['lambda_kl']
        else:
            lambda_kl = (lam['lambda_kl'] * (step + 1)
                         / self.train_config['annealing_iters'])

        mel_total_loss = mel_loss + postnet_mel_loss
        total_loss = (lam['lambda_rec'] * mel_total_loss
                      + lambda_kl * style_kl_loss
                      + lam['lambda_vq'] * content_vq_loss)

        return (total_loss, mel_loss, postnet_mel_loss, style_kl_loss,
                lambda_kl, content_vq_loss)

    __call__ = forward


if __name__ == "__main__":
    key = jax.random.PRNGKey(0)
    B, T, n_mels, D = 2, 24, 80, 32

    k = jax.random.split(key, 6)
    mel_targets = jax.random.normal(k[0], (B, T, n_mels), dtype=jnp.float32)
    mel_predictions = jax.random.normal(k[1], (B, T, n_mels), dtype=jnp.float32)
    postnet_mel_predictions = jax.random.normal(k[2], (B, T, n_mels),
                                                dtype=jnp.float32)
    mu = jax.random.normal(k[3], (B, D), dtype=jnp.float32)
    log_sigma = 0.1 * jax.random.normal(k[4], (B, D), dtype=jnp.float32)
    speaker_embeddings = jax.random.normal(k[5], (B, D), dtype=jnp.float32)

    mel_lens = jnp.array([T, T - 5], dtype=jnp.int32)   # max length == T
    max_mel_len = T
    content_vq_loss = jnp.float32(0.25)

    train_config = {
        'lambda': {
            'annealing_iters': 1000,
            'lambda_kl': 0.01,
            'lambda_rec': 1.0,
            'lambda_vq': 0.1,
        },
        'annealing_iters': 1000,
    }

    loss_fn = DisentangleLoss(None, None, train_config)
    inputs = (mel_targets, mel_lens, max_mel_len, speaker_embeddings)
    predictions = (mel_predictions, postnet_mel_predictions, None,
                   content_vq_loss, mu, log_sigma)

    step = 500
    out = loss_fn(inputs, predictions, step)
    out = jax.block_until_ready(
        tuple(o for o in out if isinstance(o, jnp.ndarray)))
    (total_loss, mel_loss, postnet_mel_loss, style_kl_loss,
     lambda_kl, vq_loss) = loss_fn(inputs, predictions, step)

    # Pure-JAX reference (same semantics as the PyTorch module).
    mask = (jnp.arange(T)[None, :] < mel_lens[:, None]).astype(jnp.float32)
    mask_ = jnp.broadcast_to(mask[:, :, None], mel_targets.shape)
    mae1 = jnp.mean(jnp.abs(mel_predictions - mel_targets))
    mae2 = jnp.mean(jnp.abs(postnet_mel_predictions - mel_targets))
    ref_mel = (mae1 * mask_).sum() / mask_.sum()
    ref_post = (mae2 * mask_).sum() / mask_.sum()
    ref_kl = 0.5 * jnp.mean(jnp.exp(log_sigma) + mu ** 2 - 1 - log_sigma)

    assert jnp.allclose(mel_loss, ref_mel, rtol=1e-5, atol=1e-6)
    assert jnp.allclose(postnet_mel_loss, ref_post, rtol=1e-5, atol=1e-6)
    assert jnp.allclose(style_kl_loss, ref_kl, rtol=1e-5, atol=1e-6)

    # Exercise the multi-tile grid, the zero-pad path (total not 128-divisible)
    # and the ragged-tail mask with a small tile size.
    T2 = 37
    k2 = jax.random.split(jax.random.PRNGKey(1), 3)
    tgt2 = jax.random.normal(k2[0], (B, T2, n_mels), dtype=jnp.float32)
    pred2 = jax.random.normal(k2[1], (B, T2, n_mels), dtype=jnp.float32)
    post2 = jax.random.normal(k2[2], (B, T2, n_mels), dtype=jnp.float32)
    sums = jax.block_until_ready(
        _loss_sums(tgt2, pred2, post2, mu, log_sigma, tile_rows=16))
    ref_s1 = jnp.sum(jnp.abs(pred2 - tgt2))
    ref_s2 = jnp.sum(jnp.abs(post2 - tgt2))
    ref_s3 = jnp.sum(jnp.exp(log_sigma) + mu ** 2 - 1 - log_sigma)
    assert jnp.allclose(sums[0], ref_s1, rtol=1e-4)
    assert jnp.allclose(sums[1], ref_s2, rtol=1e-4)
    assert jnp.allclose(sums[2], ref_s3, rtol=1e-5, atol=1e-5)

    print("KERNEL_OK")
</pallas_src>

<mosaic_0001>
module attributes {stable_mosaic.version = 11 : i64} {
  func.func @_sums_kernel(%arg0: i32, %arg1: memref<30x128xf32, #tpu.memory_space<vmem>>, %arg2: memref<30x128xf32, #tpu.memory_space<vmem>>, %arg3: memref<30x128xf32, #tpu.memory_space<vmem>>, %arg4: memref<2x32xf32, #tpu.memory_space<vmem>>, %arg5: memref<2x32xf32, #tpu.memory_space<vmem>>, %arg6: memref<3xf32, #tpu.memory_space<smem>>) attributes {dimension_semantics = [#tpu.dimension_semantics<arbitrary>], iteration_bounds = array<i64: 1>, scalar_prefetch = 0 : i64, scratch_operands = 0 : i64, tpu.core_type = #tpu.core_type<tc>, window_params = [{transform_indices = @transform_0, window_bounds = array<i64: 30, 128>}, {transform_indices = @transform_1, window_bounds = array<i64: 30, 128>}, {transform_indices = @transform_2, window_bounds = array<i64: 30, 128>}, {pipeline_mode = #tpu.pipeline_mode<synchronous>, transform_indices = @transform_3, window_bounds = array<i64: 2, 32>}, {pipeline_mode = #tpu.pipeline_mode<synchronous>, transform_indices = @transform_4, window_bounds = array<i64: 2, 32>}, {transform_indices = @transform_5, window_bounds = array<i64: 3>}]} {
    %c0_i32 = arith.constant 0 : i32
    %0 = arith.cmpi eq, %arg0, %c0_i32 : i32
    %1 = arith.extui %0 : i1 to i32
    %c0_i32_0 = arith.constant 0 : i32
    %2 = arith.cmpi ne, %1, %c0_i32_0 : i32
    scf.if %2 {
      %c0_9 = arith.constant 0 : index
      %c0_10 = arith.constant 0 : index
      %18 = vector.load %arg4[%c0_9, %c0_10] : memref<2x32xf32, #tpu.memory_space<vmem>>, vector<2x32xf32>
      %c0_11 = arith.constant 0 : index
      %c0_12 = arith.constant 0 : index
      %19 = vector.load %arg5[%c0_11, %c0_12] : memref<2x32xf32, #tpu.memory_space<vmem>>, vector<2x32xf32>
      %cst = arith.constant 0.000000e+00 : f32
      %c0_13 = arith.constant 0 : index
      %20 = memref.load %arg6[%c0_13] : memref<3xf32, #tpu.memory_space<smem>>
      memref.store %cst, %arg6[%c0_13] : memref<3xf32, #tpu.memory_space<smem>>
      %cst_14 = arith.constant 0.000000e+00 : f32
      %c1 = arith.constant 1 : index
      %21 = memref.load %arg6[%c1] : memref<3xf32, #tpu.memory_space<smem>>
      memref.store %cst_14, %arg6[%c1] : memref<3xf32, #tpu.memory_space<smem>>
      %22 = math.exp %19 : vector<2x32xf32>
      %23 = arith.mulf %18, %18 : vector<2x32xf32>
      %24 = arith.addf %22, %23 : vector<2x32xf32>
      %cst_15 = arith.constant 1.000000e+00 : f32
      %25 = vector.broadcast %cst_15 : f32 to vector<2x32xf32>
      %26 = arith.subf %24, %25 : vector<2x32xf32>
      %27 = arith.subf %26, %19 : vector<2x32xf32>
      %28 = vector.shape_cast %27 : vector<2x32xf32> to vector<1x2x32xf32>
      %cst_16 = arith.constant dense<0.000000e+00> : vector<1xf32>
      %29 = vector.multi_reduction <add>, %28, %cst_16 [1, 2] : vector<1x2x32xf32> to vector<1xf32>
      %30 = vector.shape_cast %29 : vector<1xf32> to vector<1x1x1xf32>
      %31 = vector.extract %30[0, 0, 0] : f32 from vector<1x1x1xf32>
      %c2 = arith.constant 2 : index
      %32 = memref.load %arg6[%c2] : memref<3xf32, #tpu.memory_space<smem>>
      memref.store %31, %arg6[%c2] : memref<3xf32, #tpu.memory_space<smem>>
    } else {
    }
    %c0 = arith.constant 0 : index
    %c0_1 = arith.constant 0 : index
    %3 = vector.load %arg1[%c0, %c0_1] : memref<30x128xf32, #tpu.memory_space<vmem>>, vector<30x128xf32>
    %c0_2 = arith.constant 0 : index
    %c0_3 = arith.constant 0 : index
    %4 = vector.load %arg2[%c0_2, %c0_3] : memref<30x128xf32, #tpu.memory_space<vmem>>, vector<30x128xf32>
    %5 = arith.subf %4, %3 : vector<30x128xf32>
    %6 = math.absf %5 : vector<30x128xf32>
    %c0_4 = arith.constant 0 : index
    %c0_5 = arith.constant 0 : index
    %7 = vector.load %arg3[%c0_4, %c0_5] : memref<30x128xf32, #tpu.memory_space<vmem>>, vector<30x128xf32>
    %8 = arith.subf %7, %3 : vector<30x128xf32>
    %9 = math.absf %8 : vector<30x128xf32>
    %c1_i32 = arith.constant 1 : i32
    %10 = arith.addi %arg0, %c1_i32 : i32
    %c30_i32 = arith.constant 30 : i32
    %11 = arith.muli %10, %c30_i32 : i32
    %c30_i32_6 = arith.constant 30 : i32
    %12 = arith.cmpi sle, %11, %c30_i32_6 : i32
    %13 = arith.extui %12 : i1 to i32
    %c0_i32_7 = arith.constant 0 : i32
    %14 = arith.cmpi ne, %13, %c0_i32_7 : i32
    scf.if %14 {
      %c0_9 = arith.constant 0 : index
      %18 = memref.load %arg6[%c0_9] : memref<3xf32, #tpu.memory_space<smem>>
      %19 = vector.shape_cast %6 : vector<30x128xf32> to vector<1x30x128xf32>
      %cst = arith.constant dense<0.000000e+00> : vector<1xf32>
      %20 = vector.multi_reduction <add>, %19, %cst [1, 2] : vector<1x30x128xf32> to vector<1xf32>
      %21 = vector.shape_cast %20 : vector<1xf32> to vector<1x1x1xf32>
      %22 = vector.extract %21[0, 0, 0] : f32 from vector<1x1x1xf32>
      %23 = arith.addf %18, %22 : f32
      %c0_10 = arith.constant 0 : index
      %24 = memref.load %arg6[%c0_10] : memref<3xf32, #tpu.memory_space<smem>>
      memref.store %23, %arg6[%c0_10] : memref<3xf32, #tpu.memory_space<smem>>
      %c1 = arith.constant 1 : index
      %25 = memref.load %arg6[%c1] : memref<3xf32, #tpu.memory_space<smem>>
      %26 = vector.shape_cast %9 : vector<30x128xf32> to vector<1x30x128xf32>
      %cst_11 = arith.constant dense<0.000000e+00> : vector<1xf32>
      %27 = vector.multi_reduction <add>, %26, %cst_11 [1, 2] : vector<1x30x128xf32> to vector<1xf32>
      %28 = vector.shape_cast %27 : vector<1xf32> to vector<1x1x1xf32>
      %29 = vector.extract %28[0, 0, 0] : f32 from vector<1x1x1xf32>
      %30 = arith.addf %25, %29 : f32
      %c1_12 = arith.constant 1 : index
      %31 = memref.load %arg6[%c1_12] : memref<3xf32, #tpu.memory_space<smem>>
      memref.store %30, %arg6[%c1_12] : memref<3xf32, #tpu.memory_space<smem>>
    } else {
    }
    %true = arith.constant true
    %15 = arith.xori %12, %true : i1
    %16 = arith.extui %15 : i1 to i32
    %c0_i32_8 = arith.constant 0 : i32
    %17 = arith.cmpi ne, %16, %c0_i32_8 : i32
    scf.if %17 {
      %18 = tpu.iota {dimensions = array<i32: 0>} : vector<30x128xi32>
      %c30_i32_9 = arith.constant 30 : i32
      %19 = arith.muli %arg0, %c30_i32_9 : i32
      %20 = vector.broadcast %19 : i32 to vector<30x128xi32>
      %21 = arith.addi %20, %18 : vector<30x128xi32>
      %c30_i32_10 = arith.constant 30 : i32
      %22 = vector.broadcast %c30_i32_10 : i32 to vector<30x128xi32>
      %23 = arith.cmpi slt, %21, %22 : vector<30x128xi32>
      %c0_11 = arith.constant 0 : index
      %24 = memref.load %arg6[%c0_11] : memref<3xf32, #tpu.memory_space<smem>>
      %cst = arith.constant 0.000000e+00 : f32
      %25 = vector.broadcast %cst : f32 to vector<30x128xf32>
      %26 = arith.select %23, %6, %25 : vector<30x128xi1>, vector<30x128xf32>
      %27 = vector.shape_cast %26 : vector<30x128xf32> to vector<1x30x128xf32>
      %cst_12 = arith.constant dense<0.000000e+00> : vector<1xf32>
      %28 = vector.multi_reduction <add>, %27, %cst_12 [1, 2] : vector<1x30x128xf32> to vector<1xf32>
      %29 = vector.shape_cast %28 : vector<1xf32> to vector<1x1x1xf32>
      %30 = vector.extract %29[0, 0, 0] : f32 from vector<1x1x1xf32>
      %31 = arith.addf %24, %30 : f32
      %c0_13 = arith.constant 0 : index
      %32 = memref.load %arg6[%c0_13] : memref<3xf32, #tpu.memory_space<smem>>
      memref.store %31, %arg6[%c0_13] : memref<3xf32, #tpu.memory_space<smem>>
      %c1 = arith.constant 1 : index
      %33 = memref.load %arg6[%c1] : memref<3xf32, #tpu.memory_space<smem>>
      %cst_14 = arith.constant 0.000000e+00 : f32
      %34 = vector.broadcast %cst_14 : f32 to vector<30x128xf32>
      %35 = arith.select %23, %9, %34 : vector<30x128xi1>, vector<30x128xf32>
      %36 = vector.shape_cast %35 : vector<30x128xf32> to vector<1x30x128xf32>
      %cst_15 = arith.constant dense<0.000000e+00> : vector<1xf32>
      %37 = vector.multi_reduction <add>, %36, %cst_15 [1, 2] : vector<1x30x128xf32> to vector<1xf32>
      %38 = vector.shape_cast %37 : vector<1xf32> to vector<1x1x1xf32>
      %39 = vector.extract %38[0, 0, 0] : f32 from vector<1x1x1xf32>
      %40 = arith.addf %33, %39 : f32
      %c1_16 = arith.constant 1 : index
      %41 = memref.load %arg6[%c1_16] : memref<3xf32, #tpu.memory_space<smem>>
      memref.store %40, %arg6[%c1_16] : memref<3xf32, #tpu.memory_space<smem>>
    } else {
    }
    return
  }
  func.func @transform_0(%arg0: i32) -> (i32, i32) {
    %c0_i32 = arith.constant 0 : i32
    %c0_i32_0 = arith.constant 0 : i32
    return %arg0, %c0_i32 : i32, i32
  }
  func.func @transform_1(%arg0: i32) -> (i32, i32) {
    %c0_i32 = arith.constant 0 : i32
    %c0_i32_0 = arith.constant 0 : i32
    return %arg0, %c0_i32 : i32, i32
  }
  func.func @transform_2(%arg0: i32) -> (i32, i32) {
    %c0_i32 = arith.constant 0 : i32
    %c0_i32_0 = arith.constant 0 : i32
    return %arg0, %c0_i32 : i32, i32
  }
  func.func @transform_3(%arg0: i32) -> (i32, i32) {
    %c0_i32 = arith.constant 0 : i32
    %c0_i32_0 = arith.constant 0 : i32
    %c0_i32_1 = arith.constant 0 : i32
    return %c0_i32, %c0_i32_0 : i32, i32
  }
  func.func @transform_4(%arg0: i32) -> (i32, i32) {
    %c0_i32 = arith.constant 0 : i32
    %c0_i32_0 = arith.constant 0 : i32
    %c0_i32_1 = arith.constant 0 : i32
    return %c0_i32, %c0_i32_0 : i32, i32
  }
  func.func @transform_5(%arg0: i32) -> i32 {
    %c0_i32 = arith.constant 0 : i32
    %c0_i32_0 = arith.constant 0 : i32
    return %c0_i32 : i32
  }
}

</mosaic_0001>

<bundles_post_ra>
// kernel: tpu_custom_call.1
= control target key start
LH: loop header
LB: loop body
LE: loop exit
PB: predicated region body
PF: predicated region fallthrough
CT: control target
= control target key end

     0   :  { %10 = vsyncpa [#allocation3], 0  ;;  %s452_s0 = inlined_call_operand.hbm [shape: f32[30,128], index: 0, kind: input, shape index: {}]   ;;  %s453_s1 = inlined_call_operand.hbm [shape: f32[30,128], index: 1, kind: input, shape index: {}]   ;;  %s454_s2 = inlined_call_operand.hbm [shape: f32[30,128], index: 2, kind: input, shape index: {}]   ;;  %s455_s3 = inlined_call_operand.vmem [shape: f32[2,32], index: 3, kind: input, shape index: {}]   ;;  %s456_s4 = inlined_call_operand.hbm [shape: f32[2,32], index: 4, kind: input, shape index: {}]   ;;  %s457_s5 = inlined_call_operand.hbm [shape: f32[3], index: 5, kind: output, shape index: {}]  }
   0x1   :  { %11 = vsyncpa [#allocation6], 0 }
   0x2   :  { %12 = vsyncpa [#allocation9], 0 }
   0x3   :  { %13 = vsyncpa [#allocation4], 0  ;;  %s31_s20 = sshll.u32 %s453_s1, 4  ;;  %s395_s21 = smov [#allocation5]   ;;  %s32_s20 = int_to_ptr.hbm [resolvable:$true] %s31_s20 }
   0x4   :  { %s33_s22 = sshll.u32 %s395_s21, 4  ;;  %s18_s25 = sshll.u32 %s452_s0, 4  ;;  %s34_s22 = int_to_ptr.vmem [resolvable:$true] %s33_s22  ;;  %s19_s25 = int_to_ptr.hbm [resolvable:$true] %s18_s25 }
   0x5   :  { %s396_s26 = smov 128   ;;  %s397_s27 = smov 8  }
   0x6   :  { %39 = dma.hbm_to_vmem [thread:$0]  %s32_s20, 512, %s34_s22, [#allocation6], %s396_s26, %s396_s26, %s397_s27  }
   0x7   :  { %s398_s28 = smov [#allocation2]   ;;  %s44_s7 = sshll.u32 %s454_s2, 4  ;;  %s45_s7 = int_to_ptr.hbm [resolvable:$true] %s44_s7 }
   0x8   :  { %s20_s29 = sshll.u32 %s398_s28, 4  ;;  %s60_s9 = sshll.u32 %s456_s4, 4  ;;  %s21_s29 = int_to_ptr.vmem [resolvable:$true] %s20_s29  ;;  %s61_s9 = int_to_ptr.hbm [resolvable:$true] %s60_s9 }
   0x9   :  { %26 = dma.hbm_to_vmem [thread:$0]  %s19_s25, 512, %s21_s29, [#allocation3], %s396_s26, %s396_s26, %s397_s27  }
   0xa   :  { %s399_s10 = smov [#allocation7]   ;;  %s400_s0 = smov [#allocation8]  }
   0xb   :  { %s46_s11 = sshll.u32 %s399_s10, 4  ;;  %s62_s12 = sshll.u32 %s400_s0, 4  ;;  %s47_s11 = int_to_ptr.vmem [resolvable:$true] %s46_s11  ;;  %s63_s12 = int_to_ptr.vmem [resolvable:$true] %s62_s12 }
   0xc   :  { %52 = dma.hbm_to_vmem [thread:$0]  %s45_s7, 512, %s47_s11, [#allocation6], %s396_s26, %s396_s26, %s397_s27  }
   0xd   :  { %65 = dma.hbm_to_vmem [thread:$0]  %s61_s9, 32, %s63_s12, [#allocation9]  }
   0xe   :  { %387 = dma.done.wait [#allocation3], 512  }
   0xf   :  { %388 = vsyncadd [#allocation3], 4294966784 }
  0x10   :  { %389 = dma.done.wait [#allocation6], 1024  }
  0x11   :  { %390 = vsyncadd [#allocation6], 4294966272 }
  0x12   :  { %391 = dma.done.wait [#allocation9], 32  }
  0x13   :  { %392 = vsyncadd [#allocation9], 4294967264  ;;  %v87_v0 = vld [vmem:[#allocation8] sm:$0x3]  ;;  %v112_v4 = vld [vmem:[#allocation2 + $0x8] sm:$0xff]  ;;  %vm148_vm0 = vcmask 1045504  }
  0x14   :  { %v111_v1 = vld [vmem:[#allocation2] sm:$0xff]  ;;  %v92_v3 = vmul.f32 1.442695, %v87_v0  ;;  %v113_v5 = vld [vmem:[#allocation2 + $0x10] sm:$0xff]  ;;  %v114_v6 = vld [vmem:[#allocation2 + $0x18] sm:$0x3f] }
  0x15   :  { %v86_v2 = vld [vmem:[%s455_s3] sm:$0x3]  ;;  %v128_v8 = vld [vmem:[#allocation7 + $0x8] sm:$0xff]  ;;  %v129_v9 = vld [vmem:[#allocation7 + $0x10] sm:$0xff]  ;;  %vm98_vm1 = vcmask 254976   ;;  %s247_s15 = sshll.u32 %s457_s5, 4  ;;  %s248_s15 = int_to_ptr.hbm [resolvable:$true] %s247_s15 }
  0x16   :  { %v127_v7 = vld [vmem:[#allocation7] sm:$0xff]  ;;  %277 = vpow2.f32 %v92_v3  ;;  %v130_v10 = vld [vmem:[#allocation7 + $0x18] sm:$0x3f]  ;;  %v132_v12 = vsub.f32 %v128_v8, %v112_v4  ;;  %v133_v13 = vsub.f32 %v129_v9, %v113_v5  ;;  %v116_v15 = vld [vmem:[#allocation5 + $0x8] sm:$0xff]  ;;  %v94_v22 = vmul.f32 %v86_v2, %v86_v2  ;;  %s401_s18 = smov [#allocation10]  }
  0x17   :  { %v131_v11 = vsub.f32 %v127_v7, %v111_v1  ;;  %v115_v14 = vld [vmem:[#allocation5] sm:$0xff]  ;;  %v134_v16 = vsub.f32 %v130_v10, %v114_v6  ;;  %v120_v21 = vsub.f32 %v116_v15, %v112_v4  ;;  %v117_v24 = vld [vmem:[#allocation5 + $0x10] sm:$0xff]  ;;  %v118_v26 = vld [vmem:[#allocation5 + $0x18] sm:$0x3f] }
  0x18   :  { %v119_v17 = vsub.f32 %v115_v14, %v111_v1  ;;  %v136_v19 = vand.u32 2147483647, %v132_v12  ;;  %v137_v20 = vand.u32 2147483647, %v133_v13  ;;  %v121_v30 = vsub.f32 %v117_v24, %v113_v5 }
  0x19   :  { %v135_v18 = vand.u32 2147483647, %v131_v11  ;;  %v138_v23 = vand.u32 2147483647, %v134_v16  ;;  %v124_v32 = vand.u32 2147483647, %v120_v21  ;;  %v122_v34 = vsub.f32 %v118_v26, %v114_v6 }
  0x1a   :  { %v123_v31 = vand.u32 2147483647, %v119_v17  ;;  %v125_v37 = vand.u32 2147483647, %v121_v30 }
  0x1b   :  { %v164_v25 = vadd.f32 %v136_v19, %v135_v18  ;;  %v166_v27 = vsel %vm148_vm0, %v138_v23, 0.0  ;;  %v126_v40 = vand.u32 2147483647, %v122_v34 }
  0x1c   :  { %v278_v28 = vpop.eup %277  ;;  %v146_v38 = vadd.f32 %v124_v32, %v123_v31 }
  0x1d   :  { %v165_v29 = vadd.f32 %v164_v25, %v137_v20  ;;  %v95_v33 = vadd.f32 %v278_v28, %v94_v22  ;;  %v149_v43 = vsel %vm148_vm0, %v126_v40, 0.0 }
  0x1e   :  { %v147_v42 = vadd.f32 %v146_v38, %v125_v37 }
  0x1f   :  { %v167_v35 = vadd.f32 %v166_v27, %v165_v29  ;;  %v260_v36 = vadd.f32 -1.0, %v95_v33 }
  0x20   :  { %v150_v44 = vadd.f32 %v149_v43, %v147_v42 }
  0x21   :  { %168 = vadd.xlane.f32.xlu1 %v167_v35  ;;  %v97_v39 = vsub.f32 %v260_v36, %v87_v0 }
  0x23   :  { %v99_v41 = vsel %vm98_vm1, %v97_v39, 0.0 }
  0x24   :  { %100 = vadd.xlane.f32.xlu0 %v99_v41 }
  0x2c   :  { %151 = vadd.xlane.f32.xlu0 %v150_v44 }
  0x94   :  { %v169_v45 = vpop.xlane.xlu1 %168 }
  0x95   :  { %v170_v47 = vrot.slane %v169_v45, 4 }
  0x97   :  { %v101_v46 = vpop.xlane.xlu0 %100  ;;  %v171_v50 = vadd.f32 %v170_v47, %v169_v45 }
  0x98   :  { %v102_v48 = vrot.slane %v101_v46, 4 }
  0x99   :  { %v172_v53 = vrot.slane %v171_v50, 2 }
  0x9a   :  { %v103_v49 = vadd.f32 %v102_v48, %v101_v46 }
  0x9b   :  { %v173_v59 = vadd.f32 %v172_v53, %v171_v50 }
  0x9c   :  { %v104_v51 = vrot.slane %v103_v49, 2 }
  0x9d   :  { %v174_v62 = vrot.slane %v173_v59, 1 }
  0x9e   :  { %v105_v52 = vadd.f32 %v104_v51, %v103_v49 }
  0x9f   :  { %v152_v54 = vpop.xlane.xlu0 %151  ;;  %v175_v1 = vadd.f32 %v174_v62, %v173_v59 }
  0xa0   :  { %v153_v55 = vrot.slane %v152_v54, 4  ;;  %v106_v56 = vrot.slane %v105_v52, 1 }
  0xa2   :  { %v154_v57 = vadd.f32 %v153_v55, %v152_v54  ;;  %v107_v58 = vadd.f32 %v106_v56, %v105_v52 }
  0xa4   :  { %v155_v60 = vrot.slane %v154_v57, 2  ;;  %263 = vpush %v107_v58 }
  0xa6   :  { %v156_v61 = vadd.f32 %v155_v60, %v154_v57 }
  0xa8   :  { %v157_v63 = vrot.slane %v156_v61, 1 }
  0xaa   :  { %v158_v0 = vadd.f32 %v157_v63, %v156_v61 }
  0xac   :  { %265 = vpush %v158_v0 }
  0xad   :  { %267 = vpush %v175_v1 }
  0xd5   :  { %s264_s3 = spop %263 }
  0xd6   :  { %110 = sst [smem:[#allocation10 + $0x2]] %s264_s3 }
  0xdd   :  { %s266_s16 = spop %265 }
  0xde   :  { %s268_s17 = spop %267  ;;  %162 = sst [smem:[#allocation10]] %s266_s16 }
  0xdf   :  { %179 = sst [smem:[#allocation10 + $0x1]] %s268_s17 }
  0xe0   :  { %250 = dma.smem_to_hbm %s401_s18, 16, %s248_s15, [#allocation4]  }
  0xe1   :  { %393 = dma.done.wait [#allocation4], 16  }
  0xe2   :  { %394 = vsyncadd [#allocation4], 4294967280 }
  0xe3   :  { %255 = sfence }
  0xe4   :  { %256 = vsyncpa [#allocation3], 1 }
  0xe5   :  { %257 = vsyncpa [#allocation6], 1 }
  0xe6   :  { %258 = vsyncpa [#allocation9], 1 }
  0xe7   :  { %259 = vsyncpa [#allocation4], 1 }

</bundles_post_ra>
